<compile_context>
chip_gen: v7x
topology: tpu7x:2x2x1
jax: 0.10.0
libtpu: 0.0.40
codegen_flags: <defaults>
</compile_context>

<pallas_src>
import functools

import jax
import jax.numpy as jnp
from jax.experimental import pallas as pl
from jax.experimental.pallas import tpu as pltpu

NEG_BIG = -1e30  # Python float: must NOT be a jnp array (kernel constant capture).


def _round_up(x, m):
    return (x + m - 1) // m * m


def _pick_tiles(n):
    """Returns (padded_n, dst_tile, src_tile)."""
    if n <= 128:
        npad = _round_up(n, 8)
        return npad, npad, npad          # single full-array tile
    npad = _round_up(n, 128)
    # dst tile: >=2 tiles whenever possible so megacore/v7x gets both TCs busy.
    td = 256 if (npad % 256 == 0 and npad >= 512) else 128
    # src tile: as large as divides npad (amortizes per-step overhead), capped at 2048
    # so temporaries stay comfortably inside the 32 MiB scoped-VMEM default.
    ts = 128
    for cand in (2048, 1024, 512, 256):
        if npad % cand == 0:
            ts = cand
            break
    return npad, td, ts


# ---------------------------------------------------------------------------
# Fused node transform:  x @ [Wl | Wl@a | Wr | Wr@a]   (bf16 MXU, f32 accum)
# ---------------------------------------------------------------------------
def _linear_kernel(x_ref, w_ref, o_ref):
    o_ref[...] = jnp.dot(x_ref[...].astype(jnp.bfloat16), w_ref[...],
                         preferred_element_type=jnp.float32)


def _fused_transform(x, w_bf16, *, tile_n):
    n, f_in = x.shape
    d_out = w_bf16.shape[1]
    return pl.pallas_call(
        _linear_kernel,
        out_shape=jax.ShapeDtypeStruct((n, d_out), jnp.float32),
        grid=(n // tile_n,),
        in_specs=[
            pl.BlockSpec((tile_n, f_in), lambda i: (i, 0)),
            pl.BlockSpec((f_in, d_out), lambda i: (0, 0)),
        ],
        out_specs=pl.BlockSpec((tile_n, d_out), lambda i: (i, 0)),
        compiler_params=pltpu.CompilerParams(
            dimension_semantics=("parallel",)),
    )(x, w_bf16)


# ---------------------------------------------------------------------------
# GATv2 attention with online softmax, tiled (dst, src), block-skipping
# ---------------------------------------------------------------------------
def _gatv2_attn_kernel(counts_ref, adj_ref, xr_ref, xlt_ref, xla_ref,
                       att_ref, bias_ref, out_ref, m_ref, l_ref, acc_ref,
                       *, heads, out_ch):
    """One (dst_tile, src_tile) grid step of a GATv2Conv layer.

    counts_ref: [nd, ns] i32  (SMEM, scalar-prefetched) #edges in each tile pair
    adj_ref   : [Td, Ts]      adj[dst, src] > 0 iff edge src->dst (self loops incl.)
    xr_ref    : [Td, H*C+H]   [ lin_r(x) | a.lin_r(x) per head ] for dst tile (f32)
    xlt_ref   : [H*C+H, Ts]   [ lin_l(x) | a.lin_l(x) per head ]^T for src tile (f32)
    xla_ref   : [Ts, H*C]     lin_l(x) for src tile (bf16, MXU aggregation operand)
    att_ref   : [H, C]        0.8 * attention vector (SMEM, scalar reads)
    bias_ref  : [1, H*C]
    out_ref   : [Td, H*C]
    m/l_ref   : [H, Td, 1]    online-softmax running max / denominator (VMEM scratch)
    acc_ref   : [Td, H*C]     online-softmax numerator (VMEM scratch)
    """
    i = pl.program_id(0)
    j = pl.program_id(1)
    nj = pl.num_programs(1)
    hc = heads * out_ch

    @pl.when(j == 0)
    def _init():
        m_ref[...] = jnp.full_like(m_ref, NEG_BIG)
        l_ref[...] = jnp.zeros_like(l_ref)
        acc_ref[...] = jnp.zeros_like(acc_ref)

    # Skip all compute (and all VALU work) for tiles containing no edges.
    @pl.when(counts_ref[i, j] > 0)
    def _compute():
        mask = adj_ref[...] > 0                      # [Td, Ts] bool
        xr = xr_ref[...]                             # [Td, H*C+H] f32
        xlt = xlt_ref[...]                           # [H*C+H, Ts] f32
        xla = xla_ref[...]                           # [Ts, H*C]  bf16

        for h in range(heads):
            base = h * out_ch
            # e = (a.xr_i + a.xl_j) - 0.8 * sum_c a_c * min(xr_ic + xl_jc, 0)
            # rank-1 term comes precomputed from the fused MXU transform; the loop
            # only does the LeakyReLU correction: 4 VALU ops per channel, paired to
            # halve the read-modify-write traffic on the [Td,Ts] accumulator.
            e = xr[:, hc + h:hc + h + 1] + xlt[hc + h:hc + h + 1, :]   # [Td, Ts]
            for k in range(out_ch // 2):
                c = 2 * k
                s0 = xr[:, base + c:base + c + 1] + xlt[base + c:base + c + 1, :]
                s1 = xr[:, base + c + 1:base + c + 2] + xlt[base + c + 1:base + c + 2, :]
                t0 = jnp.minimum(s0, 0.0)
                t1 = jnp.minimum(s1, 0.0)
                e = e - (att_ref[h, c] * t0 + att_ref[h, c + 1] * t1)
            if out_ch % 2:
                c = out_ch - 1
                s0 = xr[:, base + c:base + c + 1] + xlt[base + c:base + c + 1, :]
                e = e - att_ref[h, c] * jnp.minimum(s0, 0.0)

            # Mask non-edges for the running max, and zero their probabilities
            # explicitly (robust: no reliance on exp underflow).
            e = jnp.where(mask, e, NEG_BIG)
            m_prev = m_ref[h]                                    # [Td, 1]
            m_new = jnp.maximum(m_prev, jnp.max(e, axis=1, keepdims=True))
            scale = jnp.exp(m_prev - m_new)                      # [Td, 1]
            p = jnp.exp(e - m_new)                               # [Td, Ts]
            p = jnp.where(mask, p, 0.0)

            l_ref[h] = scale * l_ref[h] + jnp.sum(p, axis=1, keepdims=True)
            sl = slice(base, base + out_ch)
            acc_ref[:, sl] = scale * acc_ref[:, sl] + jnp.dot(
                p.astype(jnp.bfloat16), xla[:, sl],
                preferred_element_type=jnp.float32)
            m_ref[h] = m_new

    @pl.when(j == nj - 1)
    def _finalize():
        for h in range(heads):
            sl = slice(h * out_ch, (h + 1) * out_ch)
            acc_ref[:, sl] = acc_ref[:, sl] * pl.reciprocal(l_ref[h], approx=False)
        # One full-width (lane-dense) store + bias.
        out_ref[...] = acc_ref[...] + bias_ref[...]


def gatv2_layer(x, adj, counts, wl, wr, att, bias, *, heads, out_ch, td, ts):
    """One GATv2Conv layer (concat=True, negative_slope=0.2, self-loops baked into
    adj, no edge_attr). x, adj, counts are already padded/tiled consistently."""
    n, f_in = x.shape
    hc = heads * out_ch

    # Fused node transform: one MXU pass producing
    #   [ lin_l(x) | a.lin_l(x) per head | lin_r(x) | a.lin_r(x) per head ]
    wl_a = jnp.einsum('fhc,hc->fh', wl.reshape(f_in, heads, out_ch), att)
    wr_a = jnp.einsum('fhc,hc->fh', wr.reshape(f_in, heads, out_ch), att)
    w = jnp.concatenate([wl, wl_a, wr, wr_a], axis=1).astype(jnp.bfloat16)
    xlr = _fused_transform(x, w, tile_n=td)                 # [N, 2*(hc+H)] f32

    xl_ext = xlr[:, :hc + heads]                            # [xl | a.xl]
    xr_ext = xlr[:, hc + heads:]                            # [xr | a.xr]
    xlt_ext = xl_ext.T                                      # [(hc+H), N] score path
    xla = xl_ext[:, :hc].astype(jnp.bfloat16)               # aggregation operand

    att08 = (0.8 * att).astype(jnp.float32)                 # LeakyReLU correction scale
    bias = bias.astype(jnp.float32)

    kernel = functools.partial(_gatv2_attn_kernel, heads=heads, out_ch=out_ch)
    return pl.pallas_call(
        kernel,
        out_shape=jax.ShapeDtypeStruct((n, hc), jnp.float32),
        grid_spec=pltpu.PrefetchScalarGridSpec(
            num_scalar_prefetch=1,
            grid=(n // td, n // ts),
            in_specs=[
                pl.BlockSpec((td, ts), lambda i, j, c: (i, j)),           # adj tile
                pl.BlockSpec((td, hc + heads), lambda i, j, c: (i, 0)),   # xr_ext (dst)
                pl.BlockSpec((hc + heads, ts), lambda i, j, c: (0, j)),   # xl_ext^T (src)
                pl.BlockSpec((ts, hc), lambda i, j, c: (j, 0)),           # xla (src, bf16)
                pl.BlockSpec(memory_space=pltpu.MemorySpace.SMEM),        # att08
                pl.BlockSpec((1, hc), lambda i, j, c: (0, 0)),            # bias
            ],
            out_specs=pl.BlockSpec((td, hc), lambda i, j, c: (i, 0)),
            scratch_shapes=[
                pltpu.VMEM((heads, td, 1), jnp.float32),   # m (running max)
                pltpu.VMEM((heads, td, 1), jnp.float32),   # l (denominator)
                pltpu.VMEM((td, hc), jnp.float32),         # acc (numerator)
            ]),
        compiler_params=pltpu.CompilerParams(
            dimension_semantics=("parallel", "arbitrary")),
    )(counts, adj, xr_ext, xlt_ext, xla, att08, bias)


def gat_unit_forward(x, edge_index, params):
    """GATUnit.forward with using_edge_attr=False (the default call path)."""
    # TODO(synk): edge_attr path (lin_edge + 'mean' self-loop fill) not implemented.
    n = x.shape[0]
    npad, td, ts = _pick_tiles(n)

    x_p = jnp.pad(x.astype(jnp.float32), ((0, npad - n), (0, 0)))

    src, dst = edge_index[0], edge_index[1]
    # Dense adjacency with self-loops (add_self_loops=True default); int8 on the tiled
    # path (halves N^2 traffic), f32 for the small single-tile path. Built with two
    # scatters -- no f32 eye / max / cast passes.
    adj_dtype = jnp.int8 if npad % 128 == 0 else jnp.float32
    idx = jnp.arange(npad, dtype=jnp.int32)
    adj = jnp.zeros((npad, npad), adj_dtype)
    adj = adj.at[idx, idx].set(1)          # self loops (padded rows too: keeps l > 0)
    adj = adj.at[dst, src].set(1)          # adj[dst, src] = 1 for edge src -> dst

    # Per-(dst_tile, src_tile) occupancy table for block skipping (scalar prefetch).
    nd, ns = npad // td, npad // ts
    counts = (adj > 0).reshape(nd, td, ns, ts).any(axis=(1, 3)).astype(jnp.int32)

    h = gatv2_layer(x_p, adj, counts,
                    params["wl1"], params["wr1"], params["att1"], params["b1"],
                    heads=params["n_head"], out_ch=params["embedding_dim"],
                    td=td, ts=ts)
    out = gatv2_layer(h, adj, counts,
                      params["wl2"], params["wr2"], params["att2"], params["b2"],
                      heads=1, out_ch=params["output_dim"],
                      td=td, ts=ts)
    return out[:n]


def init_params(key, input_dim, output_dim, embedding_dim, n_head):
    ks = jax.random.split(key, 8)
    s1 = 1.0 / jnp.sqrt(jnp.float32(input_dim))
    s2 = 1.0 / jnp.sqrt(jnp.float32(embedding_dim * n_head))
    return {
        "n_head": n_head,
        "embedding_dim": embedding_dim,
        "output_dim": output_dim,
        # layer 1: GATv2Conv(input_dim, embedding_dim, heads=n_head)
        "wl1": jax.random.normal(ks[0], (input_dim, n_head * embedding_dim), jnp.float32) * s1,
        "wr1": jax.random.normal(ks[1], (input_dim, n_head * embedding_dim), jnp.float32) * s1,
        "att1": jax.random.normal(ks[2], (n_head, embedding_dim), jnp.float32) * s1,
        "b1": jnp.zeros((1, n_head * embedding_dim), jnp.float32),
        # layer 2: GATv2Conv(embedding_dim * n_head, output_dim, heads=1)
        "wl2": jax.random.normal(ks[3], (n_head * embedding_dim, output_dim), jnp.float32) * s2,
        "wr2": jax.random.normal(ks[4], (n_head * embedding_dim, output_dim), jnp.float32) * s2,
        "att2": jax.random.normal(ks[5], (1, output_dim), jnp.float32) * s2,
        "b2": jnp.zeros((1, output_dim), jnp.float32),
    }


if __name__ == "__main__":
    key = jax.random.PRNGKey(0)
    k_x, k_e, k_p = jax.random.split(key, 3)

    # Small graph: 8 nodes, input_dim=8, embedding_dim=16, output_dim=16, 2 heads.
    num_nodes = 8
    input_dim, output_dim, embedding_dim, edge_dim, n_head = 8, 16, 16, 4, 2
    num_edges = 16

    x = jax.random.normal(k_x, (num_nodes, input_dim), jnp.float32)
    edge_index = jax.random.randint(k_e, (2, num_edges), 0, num_nodes, jnp.int32)

    params = init_params(k_p, input_dim, output_dim, embedding_dim, n_head)

    out = gat_unit_forward(x, edge_index, params)
    out = jax.block_until_ready(out)
    assert out.shape == (num_nodes, output_dim)
    assert bool(jnp.all(jnp.isfinite(out)))
    print("KERNEL_OK")
</pallas_src>

<mosaic_0001>
module attributes {stable_mosaic.version = 11 : i64} {
  func.func @_linear_kernel(%arg0: i32, %arg1: memref<8x8xf32, #tpu.memory_space<vmem>>, %arg2: memref<8x68xbf16, #tpu.memory_space<vmem>>, %arg3: memref<8x68xf32, #tpu.memory_space<vmem>>) attributes {dimension_semantics = [#tpu.dimension_semantics<parallel>], iteration_bounds = array<i64: 1>, scalar_prefetch = 0 : i64, scratch_operands = 0 : i64, tpu.core_type = #tpu.core_type<tc>, window_params = [{transform_indices = @transform_0, window_bounds = array<i64: 8, 8>}, {pipeline_mode = #tpu.pipeline_mode<synchronous>, transform_indices = @transform_1, window_bounds = array<i64: 8, 68>}, {transform_indices = @transform_2, window_bounds = array<i64: 8, 68>}]} {
    %c0 = arith.constant 0 : index
    %c0_0 = arith.constant 0 : index
    %0 = vector.load %arg1[%c0, %c0_0] : memref<8x8xf32, #tpu.memory_space<vmem>>, vector<8x8xf32>
    %1 = arith.truncf %0 : vector<8x8xf32> to vector<8x8xbf16>
    %c0_1 = arith.constant 0 : index
    %c0_2 = arith.constant 0 : index
    %2 = vector.load %arg2[%c0_1, %c0_2] : memref<8x68xbf16, #tpu.memory_space<vmem>>, vector<8x68xbf16>
    %cst = arith.constant dense<0.000000e+00> : vector<8x68xf32>
    %3 = tpu.matmul %1, %2, %cst {dimension_numbers = #tpu.dot_dimension_numbers<[1], [0], [0], [1], [0, 0, 1, 1], [], []>} : vector<8x8xbf16>, vector<8x68xbf16>, vector<8x68xf32> -> vector<8x68xf32>
    %c0_3 = arith.constant 0 : index
    %c0_4 = arith.constant 0 : index
    %4 = vector.load %arg3[%c0_3, %c0_4] : memref<8x68xf32, #tpu.memory_space<vmem>>, vector<8x68xf32>
    tpu.vector_store %arg3[%c0_3, %c0_4], %3 {strides = array<i32>} : memref<8x68xf32, #tpu.memory_space<vmem>>, vector<8x68xf32>,
    return
  }
  func.func @transform_0(%arg0: i32) -> (i32, i32) {
    %c0_i32 = arith.constant 0 : i32
    %c0_i32_0 = arith.constant 0 : i32
    return %arg0, %c0_i32 : i32, i32
  }
  func.func @transform_1(%arg0: i32) -> (i32, i32) {
    %c0_i32 = arith.constant 0 : i32
    %c0_i32_0 = arith.constant 0 : i32
    %c0_i32_1 = arith.constant 0 : i32
    return %c0_i32, %c0_i32_0 : i32, i32
  }
  func.func @transform_2(%arg0: i32) -> (i32, i32) {
    %c0_i32 = arith.constant 0 : i32
    %c0_i32_0 = arith.constant 0 : i32
    return %arg0, %c0_i32 : i32, i32
  }
}

</mosaic_0001>

<bundles_post_ra>
// kernel: tpu_custom_call.1
= control target key start
LH: loop header
LB: loop body
LE: loop exit
PB: predicated region body
PF: predicated region fallthrough
CT: control target
= control target key end

     0   :  { %7 = vsyncpa [#allocation3], 0  ;;  %s248_s0 = inlined_call_operand.hbm [shape: f32[8,8], index: 0, kind: input, shape index: {}]   ;;  %s249_s1 = inlined_call_operand.hbm [shape: bf16[8,68], index: 1, kind: input, shape index: {}]   ;;  %s250_s2 = inlined_call_operand.hbm [shape: f32[8,68], index: 2, kind: output, shape index: {}]  }
   0x1   :  { %8 = vsyncpa [#allocation6], 0 }
   0x2   :  { %9 = vsyncpa [#allocation4], 0  ;;  %s192_s9 = smov [#allocation2]   ;;  %s193_s11 = smov [#allocation5]  }
   0x3   :  { %s16_s10 = sshll.u32 %s192_s9, 4  ;;  %s26_s12 = sshll.u32 %s193_s11, 4  ;;  %s17_s10 = int_to_ptr.vmem [resolvable:$true] %s16_s10  ;;  %s27_s12 = int_to_ptr.vmem [resolvable:$true] %s26_s12 }
   0x4   :  { %s120_s15 = scalar_lea.hbm %s248_s0, 128 }
   0x5   :  { %p121_p0 = scmp.ne.s32.totalorder %s248_s0, %s120_s15  ;;  %p124_p1 = scmp.lt.u32.totalorder %s120_s15, %s248_s0 }
   0x7   :  { %p126_p2 = pnand %p124_p1, %p121_p0 }
   0x9   :  { %129 = shalt.err (!%p126_p2)
}
   0xa   :  { %s130_s20 = scalar_lea.vmem %s17_s10, 128  ;;  %p135_p4 = scmp.lt.s32.totalorder %s17_s10, %s17_s10 }
   0xb   :  { %p131_p3 = scmp.ne.s32.totalorder %s17_s10, %s130_s20  ;;  %p136_p5 = scmp.lt.s32.totalorder %s130_s20, %s130_s20 }
   0xd   :  { %p137_p6 = por %p136_p5, %p135_p4 }
   0xf   :  { %p138_p7 = pnand %p137_p6, %p131_p3 }
  0x11   :  { %141 = shalt.err (!%p138_p7)
}
  0x12   :  { %19 = dma.hbm_to_vmem [thread:$0]  %s248_s0, 128, %s17_s10, [#allocation3]  }
  0x13   :  { %s142_s25 = scalar_lea.hbm %s249_s1, 64 }
  0x14   :  { %p143_p8 = scmp.ne.s32.totalorder %s249_s1, %s142_s25  ;;  %p146_p9 = scmp.lt.u32.totalorder %s142_s25, %s249_s1 }
  0x16   :  { %p148_p10 = pnand %p146_p9, %p143_p8 }
  0x18   :  { %151 = shalt.err (!%p148_p10)
}
  0x19   :  { %s152_s30 = scalar_lea.vmem %s27_s12, 64  ;;  %p157_p12 = scmp.lt.s32.totalorder %s27_s12, %s27_s12 }
  0x1a   :  { %p153_p11 = scmp.ne.s32.totalorder %s27_s12, %s152_s30  ;;  %p158_p13 = scmp.lt.s32.totalorder %s152_s30, %s152_s30 }
  0x1c   :  { %p159_p0 = por %p158_p13, %p157_p12 }
  0x1e   :  { %p160_p1 = pnand %p159_p0, %p153_p11 }
  0x20   :  { %163 = shalt.err (!%p160_p1)
}
  0x21   :  { %29 = dma.hbm_to_vmem [thread:$0]  %s249_s1, 64, %s27_s12, [#allocation6]  }
  0x22   :  { %186 = dma.done.wait [#allocation3], 128  }
  0x23   :  { %187 = vsyncadd [#allocation3], 4294967168 }
  0x24   :  { %188 = dma.done.wait [#allocation6], 64  }
  0x25   :  { %189 = vsyncadd [#allocation6], 4294967232  ;;  %v194_v0 = vmov 0.0   ;;  %vm195_vm0 = vmmov 0   ;;  %vm44_vm1 = vcmask 1043456   ;;  %v37_v2 = vld [vmem:[#allocation2] sm:$0xff] }
  0x26   :  { %109 = vmatprep.subr.bf16.mxu0 %v194_v0  ;;  %111 = vmatprep.mubr.msk.bf16.mxu0 %vm195_vm0, %v194_v0  ;;  %v39_v1 = vld [vmem:[#allocation5] sm:$0xf]  ;;  %v38_v4 = vpack.c.bf16 %v37_v2, %v37_v2  ;;  %vm40_vm2 = vcmask 64512   ;;  %s196_s4 = smov [#allocation7]   ;;  %vm88_vm3 = vcmask 556032  }
  0x27   :  { %v46_v3 = vsel %vm44_vm1, %v39_v1, 0  ;;  %s96_s5 = sshll.u32 %s196_s4, 4  ;;  %s97_s5 = int_to_ptr.vmem [resolvable:$true] %s96_s5 }
  0x28   :  { %110 = vmatpush3.bf16.msra.mxu0 %v46_v3  ;;  %s164_s1 = scalar_lea.vmem %s97_s5, 128  ;;  %p169_p3 = scmp.lt.s32.totalorder %s97_s5, %s97_s5 }
  0x29   :  { %p165_p2 = scmp.ne.s32.totalorder %s97_s5, %s164_s1  ;;  %p170_p4 = scmp.lt.s32.totalorder %s164_s1, %s164_s1 }
  0x2b   :  { %112 = vmatmul.mubr.msk.bf16.vlgmr.msra.gmra.mrb[0].mxu0 %vm40_vm2, %v38_v4  ;;  %p171_p5 = por %p170_p4, %p169_p3 }
  0x2d   :  { %p172_p6 = pnand %p171_p5, %p165_p2 }
  0xfe   :  { %v82_v5 = vpop.f32.mrb[0].mxu0 }
  0xff   :  { %v113_v6 = vpop.f32.mrb[1].mxu0  ;;  %89 = vst.msk [vmem:[#allocation7] sm:$0xff] %vm88_vm3, %v82_v5 }
 0x100   :  { %v85_v7 = vpop.f32.mrb[2].mxu0 }
 0x101   :  { %175 = shalt.err (!%p172_p6)
}
 0x102   :  { %s176_s8 = scalar_lea.hbm %s250_s2, 128 }
 0x103   :  { %p177_p7 = scmp.ne.s32.totalorder %s250_s2, %s176_s8  ;;  %p180_p8 = scmp.lt.u32.totalorder %s176_s8, %s250_s2 }
 0x105   :  { %p182_p9 = pnand %p180_p8, %p177_p7 }
 0x107   :  { %185 = shalt.err (!%p182_p9)
}
 0x108   :  { %99 = dma.vmem_to_hbm [thread:$0]  %s97_s5, 128, %s250_s2, [#allocation4]   ;;  %v114_v8 = vpop.f32.mrb[3].mxu0 }
 0x109   :  { %190 = dma.done.wait [#allocation4], 128  }
 0x10a   :  { %191 = vsyncadd [#allocation4], 4294967168 }
 0x10b   :  { %103 = vsyncpa [#allocation3], 1 }
 0x10c   :  { %104 = vsyncpa [#allocation6], 1 }
 0x10d   :  { %105 = vsyncpa [#allocation4], 1 }

</bundles_post_ra>
